<compile_context>
chip_gen: v5e
topology: v5e:2x2
jax: 0.10.0
libtpu: 0.0.40
codegen_flags: <defaults>
</compile_context>

<pallas_src>
import functools

import numpy as np
import jax
import jax.numpy as jnp
from jax import lax
from jax.experimental import pallas as pl
from jax.experimental.pallas import tpu as pltpu

EPS = 1e-5
# Scoped-VMEM cap: tiny usage at the test shape; at real shapes raise toward
# ~100 MiB on v5e/v6e (128 MiB physical) and keep <= ~56 MiB on v7x (64 MiB).
VMEM_LIMIT = 64 * 1024 * 1024


# ----------------------------------------------------------------------------
# Kernel 1: [optional fused BN-affine + ReLU on the input] -> 3x3 conv (pad=1)
#           + bias -> per-image channel partial sums / sums of squares.
# Grid iterates over the batch; each step is independent ("parallel").
# ----------------------------------------------------------------------------
def _conv_kernel(x_ref, t_ref, b_ref, scale_ref, shift_ref,
                 y_ref, stats_ref, xpad_ref, *, apply_act, cin):
    # x_ref     : (1, H, W*Cin)          lane-dense activation block
    # t_ref     : (3, (W+2)*Cin, W*Cout) row-Toeplitz weights
    # b_ref     : (1, W*Cout)            conv bias tiled along W
    # scale_ref : (1, W*Cin)             previous BN scale tiled along W
    # shift_ref : (1, W*Cin)             previous BN shift tiled along W
    # y_ref     : (1, H, W*Cout)         conv output (lane-dense)
    # stats_ref : (1, 2, W*Cout)         per-image [sum ; sum of squares]
    # xpad_ref  : VMEM (H+2, (W+2)*Cin)  zero-padded halo scratch
    H = y_ref.shape[1]
    WC = y_ref.shape[2]
    wcin = x_ref.shape[2]
    W = wcin // cin

    x = x_ref[0]                                               # (H, W*Cin)
    if apply_act:
        # Previous block's BatchNorm affine + ReLU fused into this conv's read.
        x = jnp.maximum(x * scale_ref[...] + shift_ref[...], 0.0)

    # Zero padding: only the 1-wide border strips are (re)written each step
    # (O(perimeter), correct under megacore sharding); interior fully overwritten.
    xpad_ref[0:1, :] = jnp.zeros((1, (W + 2) * cin), jnp.float32)
    xpad_ref[H + 1:H + 2, :] = jnp.zeros((1, (W + 2) * cin), jnp.float32)
    xpad_ref[1:H + 1, 0:cin] = jnp.zeros((H, cin), jnp.float32)
    xpad_ref[1:H + 1, (W + 1) * cin:(W + 2) * cin] = jnp.zeros((H, cin), jnp.float32)
    xpad_ref[1:H + 1, cin:(W + 1) * cin] = x

    # 3x3 conv as three row-shifted MXU matmuls in the W-folded layout:
    #   acc[h, w*Cout+co] = sum_ky sum_j xpad[h+ky, j] * T[ky, j, w*Cout+co]
    acc = jnp.dot(xpad_ref[0:H, :], t_ref[0],
                  preferred_element_type=jnp.float32)
    acc = acc + jnp.dot(xpad_ref[1:H + 1, :], t_ref[1],
                        preferred_element_type=jnp.float32)
    acc = acc + jnp.dot(xpad_ref[2:H + 2, :], t_ref[2],
                        preferred_element_type=jnp.float32)
    acc = acc + b_ref[...]                                     # (1, W*Cout) bcast

    y_ref[...] = acc.reshape(1, H, WC)
    # Per-image partial BN statistics (reduced over N and W in the wrapper).
    stats_ref[:, 0:1, :] = jnp.sum(acc, axis=0, keepdims=True).reshape(1, 1, WC)
    stats_ref[:, 1:2, :] = jnp.sum(acc * acc, axis=0, keepdims=True).reshape(1, 1, WC)


def _toeplitz_weights(w_oihw, W):
    """OIHW (Cout, Cin, 3, 3) -> row-Toeplitz T of shape (3, (W+2)*Cin, W*Cout).

    T[ky, x'*Cin + ci, w*Cout + co] = w[co, ci, ky, x'-w] for 0 <= x'-w <= 2, else 0.
    """
    cout, cin, kh, kw = w_oihw.shape
    w_hwio = jnp.transpose(w_oihw, (2, 3, 1, 0))               # (3, 3, Cin, Cout)
    sel = np.zeros((W + 2, W, kw), np.float32)                 # constant scatter map
    for kx in range(kw):
        for w in range(W):
            sel[w + kx, w, kx] = 1.0
    t = jnp.einsum("xwk,nkio->nxiwo", jnp.asarray(sel), w_hwio)
    return t.reshape(kh, (W + 2) * cin, W * cout)


def conv_bn_stats(x_act, t_w, bias_t, scale_t, shift_t, *, cin, cout, apply_act):
    N, H, WCIN = x_act.shape
    W = WCIN // cin
    WC = W * cout
    K2 = (W + 2) * cin
    kern = functools.partial(_conv_kernel, apply_act=apply_act, cin=cin)
    cost = pl.CostEstimate(
        flops=2 * N * H * 3 * K2 * WC + 4 * N * H * WC,
        transcendentals=0,
        bytes_accessed=4 * (N * H * WCIN + 3 * K2 * WC + N * H * WC + N * 2 * WC))
    return pl.pallas_call(
        kern,
        out_shape=(jax.ShapeDtypeStruct((N, H, WC), jnp.float32),
                   jax.ShapeDtypeStruct((N, 2, WC), jnp.float32)),
        grid_spec=pltpu.PrefetchScalarGridSpec(
            num_scalar_prefetch=0,
            grid=(N,),
            in_specs=[
                pl.BlockSpec((1, H, WCIN), lambda n: (n, 0, 0)),
                pl.BlockSpec((3, K2, WC), lambda n: (0, 0, 0)),
                pl.BlockSpec((1, WC), lambda n: (0, 0)),
                pl.BlockSpec((1, WCIN), lambda n: (0, 0)),
                pl.BlockSpec((1, WCIN), lambda n: (0, 0)),
            ],
            out_specs=(pl.BlockSpec((1, H, WC), lambda n: (n, 0, 0)),
                       pl.BlockSpec((1, 2, WC), lambda n: (n, 0, 0))),
            scratch_shapes=[pltpu.VMEM((H + 2, K2), jnp.float32)]),
        compiler_params=pltpu.CompilerParams(
            dimension_semantics=("parallel",),
            vmem_limit_bytes=VMEM_LIMIT),
        cost_estimate=cost,
    )(x_act, t_w, bias_t, scale_t, shift_t)


# ----------------------------------------------------------------------------
# Kernel 2: final BatchNorm affine + ReLU, lane-dense (lane axis = W*C).
# ----------------------------------------------------------------------------
def bn_relu_kernel(y_ref, scale_ref, shift_ref, o_ref):
    # y_ref/o_ref: (1, H, W*C);  scale_ref/shift_ref: (1, W*C) (channel-tiled)
    o_ref[...] = jnp.maximum(y_ref[...] * scale_ref[...] + shift_ref[...], 0.0)


def bn_relu(y_act, scale_t, shift_t):
    N, H, WC = y_act.shape
    return pl.pallas_call(
        bn_relu_kernel,
        out_shape=jax.ShapeDtypeStruct((N, H, WC), jnp.float32),
        grid_spec=pltpu.PrefetchScalarGridSpec(
            num_scalar_prefetch=0,
            grid=(N,),
            in_specs=[pl.BlockSpec((1, H, WC), lambda n: (n, 0, 0)),
                      pl.BlockSpec((1, WC), lambda n: (0, 0)),
                      pl.BlockSpec((1, WC), lambda n: (0, 0))],
            out_specs=pl.BlockSpec((1, H, WC), lambda n: (n, 0, 0))),
        compiler_params=pltpu.CompilerParams(
            dimension_semantics=("parallel",),
            vmem_limit_bytes=VMEM_LIMIT),
        cost_estimate=pl.CostEstimate(
            flops=2 * N * H * WC, transcendentals=0,
            bytes_accessed=4 * (2 * N * H * WC + 2 * WC)),
    )(y_act, scale_t, shift_t)


# ----------------------------------------------------------------------------
# DoubleConv forward
# ----------------------------------------------------------------------------
def finalize_stats(stats, W, cout, count):
    # stats: (N, 2, W*Cout) per-image partials -> per-channel (mean, inv_std).
    st = jnp.sum(stats.reshape(stats.shape[0], 2, W, cout), axis=(0, 2))  # (2, Cout)
    mean = st[0] / count
    var = st[1] / count - mean * mean              # biased var (BN training mode)
    # TODO(synk): E[y^2]-E[y]^2 is cancellation-prone for large |mean|/std; switch to
    # a shifted / Welford-style reduction for extreme input distributions.
    inv_std = lax.rsqrt(var + EPS)
    return mean, inv_std


def double_conv_forward(x_nchw, params):
    N, Cin, H, W = x_nchw.shape
    count = jnp.float32(N * H * W)
    # NCHW -> lane-dense (N, H, W*Cin): lane index = w*Cin + c.
    x = jnp.transpose(x_nchw, (0, 2, 3, 1)).reshape(N, H, W * Cin)

    Cout = params["w1"].shape[0]
    t1 = _toeplitz_weights(params["w1"], W)
    b1_t = jnp.tile(params["b1"], W).reshape(1, W * Cout)
    ones_t = jnp.ones((1, W * Cin), jnp.float32)
    zeros_t = jnp.zeros((1, W * Cin), jnp.float32)

    # Block 1: conv1 + per-image stats (raw input, no fused activation).
    y1, st1 = conv_bn_stats(x, t1, b1_t, ones_t, zeros_t,
                            cin=Cin, cout=Cout, apply_act=False)
    mean1, inv1 = finalize_stats(st1, W, Cout, count)
    scale1 = params["gamma1"] * inv1
    shift1 = params["beta1"] - mean1 * scale1

    # Block 2: BN1+ReLU fused into conv2's input read, conv2 + per-image stats.
    t2 = _toeplitz_weights(params["w2"], W)
    b2_t = jnp.tile(params["b2"], W).reshape(1, W * Cout)
    scale1_t = jnp.tile(scale1, W).reshape(1, W * Cout)
    shift1_t = jnp.tile(shift1, W).reshape(1, W * Cout)
    y2, st2 = conv_bn_stats(y1, t2, b2_t, scale1_t, shift1_t,
                            cin=Cout, cout=Cout, apply_act=True)
    mean2, inv2 = finalize_stats(st2, W, Cout, count)
    scale2 = params["gamma2"] * inv2
    shift2 = params["beta2"] - mean2 * scale2

    # Final BN2 + ReLU (lane-dense elementwise pass).
    out = bn_relu(y2,
                  jnp.tile(scale2, W).reshape(1, W * Cout),
                  jnp.tile(shift2, W).reshape(1, W * Cout))
    out = out.reshape(N, H, W, Cout)
    return jnp.transpose(out, (0, 3, 1, 2))                    # -> NCHW


# ----------------------------------------------------------------------------
# Pure-JAX reference (training-mode BatchNorm, matches torch defaults)
# ----------------------------------------------------------------------------
def ref_double_conv(x_nchw, params):
    def block(x, w, b, gamma, beta):
        y = lax.conv_general_dilated(
            x, w, window_strides=(1, 1), padding=((1, 1), (1, 1)),
            dimension_numbers=("NCHW", "OIHW", "NCHW"))
        y = y + b.reshape(1, -1, 1, 1)
        mean = jnp.mean(y, axis=(0, 2, 3), keepdims=True)
        var = jnp.mean((y - mean) ** 2, axis=(0, 2, 3), keepdims=True)
        y = (y - mean) * lax.rsqrt(var + EPS)
        y = y * gamma.reshape(1, -1, 1, 1) + beta.reshape(1, -1, 1, 1)
        return jnp.maximum(y, 0.0)

    y = block(x_nchw, params["w1"], params["b1"], params["gamma1"], params["beta1"])
    y = block(y, params["w2"], params["b2"], params["gamma2"], params["beta2"])
    return y


if __name__ == "__main__":
    key = jax.random.PRNGKey(0)
    kx, kw1, kb1, kw2, kb2 = jax.random.split(key, 5)

    N, Cin, Cout, H, W = 2, 4, 8, 16, 16
    x = jax.random.normal(kx, (N, Cin, H, W), dtype=jnp.float32)

    # Deterministic parameter init (shapes per nn.Conv2d / nn.BatchNorm2d).
    params = {
        "w1": jax.random.normal(kw1, (Cout, Cin, 3, 3), jnp.float32) * 0.1,
        "b1": jax.random.normal(kb1, (Cout,), jnp.float32) * 0.1,
        "gamma1": jnp.ones((Cout,), jnp.float32),
        "beta1": jnp.zeros((Cout,), jnp.float32),
        "w2": jax.random.normal(kw2, (Cout, Cout, 3, 3), jnp.float32) * 0.1,
        "b2": jax.random.normal(kb2, (Cout,), jnp.float32) * 0.1,
        "gamma2": jnp.ones((Cout,), jnp.float32),
        "beta2": jnp.zeros((Cout,), jnp.float32),
    }

    fwd = jax.jit(double_conv_forward)
    out = jax.block_until_ready(fwd(x, params))
    ref = jax.block_until_ready(ref_double_conv(x, params))

    assert out.shape == (N, Cout, H, W), out.shape
    assert jnp.allclose(out, ref, rtol=1e-4, atol=1e-4), (
        float(jnp.max(jnp.abs(out - ref))))

    print("KERNEL_OK")
</pallas_src>

<mosaic_0001>
module attributes {stable_mosaic.version = 11 : i64} {
  func.func @_conv_kernel(%arg0: i32, %arg1: memref<1x16x64xf32, #tpu.memory_space<vmem>>, %arg2: memref<3x72x128xf32, #tpu.memory_space<vmem>>, %arg3: memref<1x128xf32, #tpu.memory_space<vmem>>, %arg4: memref<1x64xf32, #tpu.memory_space<vmem>>, %arg5: memref<1x64xf32, #tpu.memory_space<vmem>>, %arg6: memref<1x16x128xf32, #tpu.memory_space<vmem>>, %arg7: memref<1x2x128xf32, #tpu.memory_space<vmem>>, %arg8: memref<18x72xf32, #tpu.memory_space<vmem>>) attributes {dimension_semantics = [#tpu.dimension_semantics<parallel>], iteration_bounds = array<i64: 2>, scalar_prefetch = 0 : i64, scratch_operands = 1 : i64, tpu.core_type = #tpu.core_type<tc>, window_params = [{transform_indices = @transform_0, window_bounds = array<i64: 1, 16, 64>}, {pipeline_mode = #tpu.pipeline_mode<synchronous>, transform_indices = @transform_1, window_bounds = array<i64: 3, 72, 128>}, {pipeline_mode = #tpu.pipeline_mode<synchronous>, transform_indices = @transform_2, window_bounds = array<i64: 1, 128>}, {pipeline_mode = #tpu.pipeline_mode<synchronous>, transform_indices = @transform_3, window_bounds = array<i64: 1, 64>}, {pipeline_mode = #tpu.pipeline_mode<synchronous>, transform_indices = @transform_4, window_bounds = array<i64: 1, 64>}, {transform_indices = @transform_5, window_bounds = array<i64: 1, 16, 128>}, {transform_indices = @transform_6, window_bounds = array<i64: 1, 2, 128>}]} {
    %c0 = arith.constant 0 : index
    %c0_0 = arith.constant 0 : index
    %c0_1 = arith.constant 0 : index
    %0 = vector.load %arg1[%c0, %c0_0, %c0_1] : memref<1x16x64xf32, #tpu.memory_space<vmem>>, vector<1x16x64xf32>
    %1 = vector.shape_cast %0 : vector<1x16x64xf32> to vector<16x64xf32>
    %cst = arith.constant 0.000000e+00 : f32
    %2 = vector.broadcast %cst : f32 to vector<1x72xf32>
    %c0_2 = arith.constant 0 : index
    %c0_3 = arith.constant 0 : index
    %3 = vector.load %arg8[%c0_2, %c0_3] : memref<18x72xf32, #tpu.memory_space<vmem>>, vector<1x72xf32>
    tpu.vector_store %arg8[%c0_2, %c0_3], %2 {strides = array<i32>} : memref<18x72xf32, #tpu.memory_space<vmem>>, vector<1x72xf32>,
    %cst_4 = arith.constant 0.000000e+00 : f32
    %4 = vector.broadcast %cst_4 : f32 to vector<1x72xf32>
    %c17 = arith.constant 17 : index
    %c0_5 = arith.constant 0 : index
    %5 = vector.load %arg8[%c17, %c0_5] : memref<18x72xf32, #tpu.memory_space<vmem>>, vector<1x72xf32>
    tpu.vector_store %arg8[%c17, %c0_5], %4 {strides = array<i32>} : memref<18x72xf32, #tpu.memory_space<vmem>>, vector<1x72xf32>,
    %cst_6 = arith.constant 0.000000e+00 : f32
    %6 = vector.broadcast %cst_6 : f32 to vector<16x4xf32>
    %c1 = arith.constant 1 : index
    %c0_7 = arith.constant 0 : index
    %7 = vector.load %arg8[%c1, %c0_7] : memref<18x72xf32, #tpu.memory_space<vmem>>, vector<16x4xf32>
    tpu.vector_store %arg8[%c1, %c0_7], %6 {strides = array<i32>} : memref<18x72xf32, #tpu.memory_space<vmem>>, vector<16x4xf32>,
    %cst_8 = arith.constant 0.000000e+00 : f32
    %8 = vector.broadcast %cst_8 : f32 to vector<16x4xf32>
    %c1_9 = arith.constant 1 : index
    %c68 = arith.constant 68 : index
    %9 = vector.load %arg8[%c1_9, %c68] : memref<18x72xf32, #tpu.memory_space<vmem>>, vector<16x4xf32>
    tpu.vector_store %arg8[%c1_9, %c68], %8 {strides = array<i32>} : memref<18x72xf32, #tpu.memory_space<vmem>>, vector<16x4xf32>,
    %c1_10 = arith.constant 1 : index
    %c4 = arith.constant 4 : index
    %10 = vector.load %arg8[%c1_10, %c4] : memref<18x72xf32, #tpu.memory_space<vmem>>, vector<16x64xf32>
    tpu.vector_store %arg8[%c1_10, %c4], %1 {strides = array<i32>} : memref<18x72xf32, #tpu.memory_space<vmem>>, vector<16x64xf32>,
    %c0_11 = arith.constant 0 : index
    %c0_12 = arith.constant 0 : index
    %11 = vector.load %arg8[%c0_11, %c0_12] : memref<18x72xf32, #tpu.memory_space<vmem>>, vector<16x72xf32>
    %c0_13 = arith.constant 0 : index
    %c0_14 = arith.constant 0 : index
    %c0_15 = arith.constant 0 : index
    %12 = vector.load %arg2[%c0_13, %c0_14, %c0_15] : memref<3x72x128xf32, #tpu.memory_space<vmem>>, vector<1x72x128xf32>
    %13 = vector.shape_cast %12 : vector<1x72x128xf32> to vector<72x128xf32>
    %cst_16 = arith.constant dense<0.000000e+00> : vector<16x128xf32>
    %14 = tpu.matmul %11, %13, %cst_16 {dimension_numbers = #tpu.dot_dimension_numbers<[1], [0], [0], [1], [0, 0, 1, 1], [], []>} : vector<16x72xf32>, vector<72x128xf32>, vector<16x128xf32> -> vector<16x128xf32>
    %c1_17 = arith.constant 1 : index
    %c0_18 = arith.constant 0 : index
    %15 = vector.load %arg8[%c1_17, %c0_18] : memref<18x72xf32, #tpu.memory_space<vmem>>, vector<16x72xf32>
    %c1_19 = arith.constant 1 : index
    %c0_20 = arith.constant 0 : index
    %c0_21 = arith.constant 0 : index
    %16 = vector.load %arg2[%c1_19, %c0_20, %c0_21] : memref<3x72x128xf32, #tpu.memory_space<vmem>>, vector<1x72x128xf32>
    %17 = vector.shape_cast %16 : vector<1x72x128xf32> to vector<72x128xf32>
    %cst_22 = arith.constant dense<0.000000e+00> : vector<16x128xf32>
    %18 = tpu.matmul %15, %17, %cst_22 {dimension_numbers = #tpu.dot_dimension_numbers<[1], [0], [0], [1], [0, 0, 1, 1], [], []>} : vector<16x72xf32>, vector<72x128xf32>, vector<16x128xf32> -> vector<16x128xf32>
    %19 = arith.addf %14, %18 : vector<16x128xf32>
    %c2 = arith.constant 2 : index
    %c0_23 = arith.constant 0 : index
    %20 = vector.load %arg8[%c2, %c0_23] : memref<18x72xf32, #tpu.memory_space<vmem>>, vector<16x72xf32>
    %c2_24 = arith.constant 2 : index
    %c0_25 = arith.constant 0 : index
    %c0_26 = arith.constant 0 : index
    %21 = vector.load %arg2[%c2_24, %c0_25, %c0_26] : memref<3x72x128xf32, #tpu.memory_space<vmem>>, vector<1x72x128xf32>
    %22 = vector.shape_cast %21 : vector<1x72x128xf32> to vector<72x128xf32>
    %cst_27 = arith.constant dense<0.000000e+00> : vector<16x128xf32>
    %23 = tpu.matmul %20, %22, %cst_27 {dimension_numbers = #tpu.dot_dimension_numbers<[1], [0], [0], [1], [0, 0, 1, 1], [], []>} : vector<16x72xf32>, vector<72x128xf32>, vector<16x128xf32> -> vector<16x128xf32>
    %24 = arith.addf %19, %23 : vector<16x128xf32>
    %c0_28 = arith.constant 0 : index
    %c0_29 = arith.constant 0 : index
    %25 = vector.load %arg3[%c0_28, %c0_29] : memref<1x128xf32, #tpu.memory_space<vmem>>, vector<1x128xf32>
    %26 = vector.broadcast %25 : vector<1x128xf32> to vector<16x128xf32>
    %27 = arith.addf %24, %26 : vector<16x128xf32>
    %28 = vector.shape_cast %27 : vector<16x128xf32> to vector<1x16x128xf32>
    %c0_30 = arith.constant 0 : index
    %c0_31 = arith.constant 0 : index
    %c0_32 = arith.constant 0 : index
    %29 = vector.load %arg6[%c0_30, %c0_31, %c0_32] : memref<1x16x128xf32, #tpu.memory_space<vmem>>, vector<1x16x128xf32>
    tpu.vector_store %arg6[%c0_30, %c0_31, %c0_32], %28 {strides = array<i32>} : memref<1x16x128xf32, #tpu.memory_space<vmem>>, vector<1x16x128xf32>,
    %cst_33 = arith.constant dense<0.000000e+00> : vector<128xf32>
    %30 = vector.multi_reduction <add>, %27, %cst_33 [0] : vector<16x128xf32> to vector<128xf32>
    %31 = vector.shape_cast %30 : vector<128xf32> to vector<1x128xf32>
    %32 = vector.shape_cast %31 : vector<1x128xf32> to vector<1x1x128xf32>
    %c0_34 = arith.constant 0 : index
    %c0_35 = arith.constant 0 : index
    %c0_36 = arith.constant 0 : index
    %33 = vector.load %arg7[%c0_34, %c0_35, %c0_36] : memref<1x2x128xf32, #tpu.memory_space<vmem>>, vector<1x1x128xf32>
    tpu.vector_store %arg7[%c0_34, %c0_35, %c0_36], %32 {strides = array<i32>} : memref<1x2x128xf32, #tpu.memory_space<vmem>>, vector<1x1x128xf32>,
    %34 = arith.mulf %27, %27 : vector<16x128xf32>
    %cst_37 = arith.constant dense<0.000000e+00> : vector<128xf32>
    %35 = vector.multi_reduction <add>, %34, %cst_37 [0] : vector<16x128xf32> to vector<128xf32>
    %36 = vector.shape_cast %35 : vector<128xf32> to vector<1x128xf32>
    %37 = vector.shape_cast %36 : vector<1x128xf32> to vector<1x1x128xf32>
    %c0_38 = arith.constant 0 : index
    %c1_39 = arith.constant 1 : index
    %c0_40 = arith.constant 0 : index
    %38 = vector.load %arg7[%c0_38, %c1_39, %c0_40] : memref<1x2x128xf32, #tpu.memory_space<vmem>>, vector<1x1x128xf32>
    tpu.vector_store %arg7[%c0_38, %c1_39, %c0_40], %37 {strides = array<i32>} : memref<1x2x128xf32, #tpu.memory_space<vmem>>, vector<1x1x128xf32>,
    return
  }
  func.func @transform_0(%arg0: i32) -> (i32, i32, i32) {
    %c0_i32 = arith.constant 0 : i32
    %c0_i32_0 = arith.constant 0 : i32
    %c0_i32_1 = arith.constant 0 : i32
    return %arg0, %c0_i32, %c0_i32_0 : i32, i32, i32
  }
  func.func @transform_1(%arg0: i32) -> (i32, i32, i32) {
    %c0_i32 = arith.constant 0 : i32
    %c0_i32_0 = arith.constant 0 : i32
    %c0_i32_1 = arith.constant 0 : i32
    %c0_i32_2 = arith.constant 0 : i32
    return %c0_i32, %c0_i32_0, %c0_i32_1 : i32, i32, i32
  }
  func.func @transform_2(%arg0: i32) -> (i32, i32) {
    %c0_i32 = arith.constant 0 : i32
    %c0_i32_0 = arith.constant 0 : i32
    %c0_i32_1 = arith.constant 0 : i32
    return %c0_i32, %c0_i32_0 : i32, i32
  }
  func.func @transform_3(%arg0: i32) -> (i32, i32) {
    %c0_i32 = arith.constant 0 : i32
    %c0_i32_0 = arith.constant 0 : i32
    %c0_i32_1 = arith.constant 0 : i32
    return %c0_i32, %c0_i32_0 : i32, i32
  }
  func.func @transform_4(%arg0: i32) -> (i32, i32) {
    %c0_i32 = arith.constant 0 : i32
    %c0_i32_0 = arith.constant 0 : i32
    %c0_i32_1 = arith.constant 0 : i32
    return %c0_i32, %c0_i32_0 : i32, i32
  }
  func.func @transform_5(%arg0: i32) -> (i32, i32, i32) {
    %c0_i32 = arith.constant 0 : i32
    %c0_i32_0 = arith.constant 0 : i32
    %c0_i32_1 = arith.constant 0 : i32
    return %arg0, %c0_i32, %c0_i32_0 : i32, i32, i32
  }
  func.func @transform_6(%arg0: i32) -> (i32, i32, i32) {
    %c0_i32 = arith.constant 0 : i32
    %c0_i32_0 = arith.constant 0 : i32
    %c0_i32_1 = arith.constant 0 : i32
    return %arg0, %c0_i32, %c0_i32_0 : i32, i32, i32
  }
}

module attributes {stable_mosaic.version = 11 : i64} {
  func.func @_conv_kernel(%arg0: i32, %arg1: memref<1x16x128xf32, #tpu.memory_space<vmem>>, %arg2: memref<3x144x128xf32, #tpu.memory_space<vmem>>, %arg3: memref<1x128xf32, #tpu.memory_space<vmem>>, %arg4: memref<1x128xf32, #tpu.memory_space<vmem>>, %arg5: memref<1x128xf32, #tpu.memory_space<vmem>>, %arg6: memref<1x16x128xf32, #tpu.memory_space<vmem>>, %arg7: memref<1x2x128xf32, #tpu.memory_space<vmem>>, %arg8: memref<18x144xf32, #tpu.memory_space<vmem>>) attributes {dimension_semantics = [#tpu.dimension_semantics<parallel>], iteration_bounds = array<i64: 2>, scalar_prefetch = 0 : i64, scratch_operands = 1 : i64, tpu.core_type = #tpu.core_type<tc>, window_params = [{transform_indices = @transform_0, window_bounds = array<i64: 1, 16, 128>}, {pipeline_mode = #tpu.pipeline_mode<synchronous>, transform_indices = @transform_1, window_bounds = array<i64: 3, 144, 128>}, {pipeline_mode = #tpu.pipeline_mode<synchronous>, transform_indices = @transform_2, window_bounds = array<i64: 1, 128>}, {pipeline_mode = #tpu.pipeline_mode<synchronous>, transform_indices = @transform_3, window_bounds = array<i64: 1, 128>}, {pipeline_mode = #tpu.pipeline_mode<synchronous>, transform_indices = @transform_4, window_bounds = array<i64: 1, 128>}, {transform_indices = @transform_5, window_bounds = array<i64: 1, 16, 128>}, {transform_indices = @transform_6, window_bounds = array<i64: 1, 2, 128>}]} {
    %c0 = arith.constant 0 : index
    %c0_0 = arith.constant 0 : index
    %c0_1 = arith.constant 0 : index
    %0 = vector.load %arg1[%c0, %c0_0, %c0_1] : memref<1x16x128xf32, #tpu.memory_space<vmem>>, vector<1x16x128xf32>
    %1 = vector.shape_cast %0 : vector<1x16x128xf32> to vector<16x128xf32>
    %c0_2 = arith.constant 0 : index
    %c0_3 = arith.constant 0 : index
    %2 = vector.load %arg4[%c0_2, %c0_3] : memref<1x128xf32, #tpu.memory_space<vmem>>, vector<1x128xf32>
    %3 = vector.broadcast %2 : vector<1x128xf32> to vector<16x128xf32>
    %4 = arith.mulf %1, %3 : vector<16x128xf32>
    %c0_4 = arith.constant 0 : index
    %c0_5 = arith.constant 0 : index
    %5 = vector.load %arg5[%c0_4, %c0_5] : memref<1x128xf32, #tpu.memory_space<vmem>>, vector<1x128xf32>
    %6 = vector.broadcast %5 : vector<1x128xf32> to vector<16x128xf32>
    %7 = arith.addf %4, %6 : vector<16x128xf32>
    %cst = arith.constant 0.000000e+00 : f32
    %8 = vector.broadcast %cst : f32 to vector<16x128xf32>
    %9 = arith.maximumf %7, %8 : vector<16x128xf32>
    %cst_6 = arith.constant 0.000000e+00 : f32
    %10 = vector.broadcast %cst_6 : f32 to vector<1x144xf32>
    %c0_7 = arith.constant 0 : index
    %c0_8 = arith.constant 0 : index
    %11 = vector.load %arg8[%c0_7, %c0_8] : memref<18x144xf32, #tpu.memory_space<vmem>>, vector<1x144xf32>
    tpu.vector_store %arg8[%c0_7, %c0_8], %10 {strides = array<i32>} : memref<18x144xf32, #tpu.memory_space<vmem>>, vector<1x144xf32>,
    %cst_9 = arith.constant 0.000000e+00 : f32
    %12 = vector.broadcast %cst_9 : f32 to vector<1x144xf32>
    %c17 = arith.constant 17 : index
    %c0_10 = arith.constant 0 : index
    %13 = vector.load %arg8[%c17, %c0_10] : memref<18x144xf32, #tpu.memory_space<vmem>>, vector<1x144xf32>
    tpu.vector_store %arg8[%c17, %c0_10], %12 {strides = array<i32>} : memref<18x144xf32, #tpu.memory_space<vmem>>, vector<1x144xf32>,
    %cst_11 = arith.constant 0.000000e+00 : f32
    %14 = vector.broadcast %cst_11 : f32 to vector<16x8xf32>
    %c1 = arith.constant 1 : index
    %c0_12 = arith.constant 0 : index
    %15 = vector.load %arg8[%c1, %c0_12] : memref<18x144xf32, #tpu.memory_space<vmem>>, vector<16x8xf32>
    tpu.vector_store %arg8[%c1, %c0_12], %14 {strides = array<i32>} : memref<18x144xf32, #tpu.memory_space<vmem>>, vector<16x8xf32>,
    %cst_13 = arith.constant 0.000000e+00 : f32
    %16 = vector.broadcast %cst_13 : f32 to vector<16x8xf32>
    %c1_14 = arith.constant 1 : index
    %c136 = arith.constant 136 : index
    %17 = vector.load %arg8[%c1_14, %c136] : memref<18x144xf32, #tpu.memory_space<vmem>>, vector<16x8xf32>
    tpu.vector_store %arg8[%c1_14, %c136], %16 {strides = array<i32>} : memref<18x144xf32, #tpu.memory_space<vmem>>, vector<16x8xf32>,
    %c1_15 = arith.constant 1 : index
    %c8 = arith.constant 8 : index
    %18 = vector.load %arg8[%c1_15, %c8] : memref<18x144xf32, #tpu.memory_space<vmem>>, vector<16x128xf32>
    tpu.vector_store %arg8[%c1_15, %c8], %9 {strides = array<i32>} : memref<18x144xf32, #tpu.memory_space<vmem>>, vector<16x128xf32>,
    %c0_16 = arith.constant 0 : index
    %c0_17 = arith.constant 0 : index
    %19 = vector.load %arg8[%c0_16, %c0_17] : memref<18x144xf32, #tpu.memory_space<vmem>>, vector<16x144xf32>
    %c0_18 = arith.constant 0 : index
    %c0_19 = arith.constant 0 : index
    %c0_20 = arith.constant 0 : index
    %20 = vector.load %arg2[%c0_18, %c0_19, %c0_20] : memref<3x144x128xf32, #tpu.memory_space<vmem>>, vector<1x144x128xf32>
    %21 = vector.shape_cast %20 : vector<1x144x128xf32> to vector<144x128xf32>
    %cst_21 = arith.constant dense<0.000000e+00> : vector<16x128xf32>
    %22 = tpu.matmul %19, %21, %cst_21 {dimension_numbers = #tpu.dot_dimension_numbers<[1], [0], [0], [1], [0, 0, 1, 1], [], []>} : vector<16x144xf32>, vector<144x128xf32>, vector<16x128xf32> -> vector<16x128xf32>
    %c1_22 = arith.constant 1 : index
    %c0_23 = arith.constant 0 : index
    %23 = vector.load %arg8[%c1_22, %c0_23] : memref<18x144xf32, #tpu.memory_space<vmem>>, vector<16x144xf32>
    %c1_24 = arith.constant 1 : index
    %c0_25 = arith.constant 0 : index
    %c0_26 = arith.constant 0 : index
    %24 = vector.load %arg2[%c1_24, %c0_25, %c0_26] : memref<3x144x128xf32, #tpu.memory_space<vmem>>, vector<1x144x128xf32>
    %25 = vector.shape_cast %24 : vector<1x144x128xf32> to vector<144x128xf32>
    %cst_27 = arith.constant dense<0.000000e+00> : vector<16x128xf32>
    %26 = tpu.matmul %23, %25, %cst_27 {dimension_numbers = #tpu.dot_dimension_numbers<[1], [0], [0], [1], [0, 0, 1, 1], [], []>} : vector<16x144xf32>, vector<144x128xf32>, vector<16x128xf32> -> vector<16x128xf32>
    %27 = arith.addf %22, %26 : vector<16x128xf32>
    %c2 = arith.constant 2 : index
    %c0_28 = arith.constant 0 : index
    %28 = vector.load %arg8[%c2, %c0_28] : memref<18x144xf32, #tpu.memory_space<vmem>>, vector<16x144xf32>
    %c2_29 = arith.constant 2 : index
    %c0_30 = arith.constant 0 : index
    %c0_31 = arith.constant 0 : index
    %29 = vector.load %arg2[%c2_29, %c0_30, %c0_31] : memref<3x144x128xf32, #tpu.memory_space<vmem>>, vector<1x144x128xf32>
    %30 = vector.shape_cast %29 : vector<1x144x128xf32> to vector<144x128xf32>
    %cst_32 = arith.constant dense<0.000000e+00> : vector<16x128xf32>
    %31 = tpu.matmul %28, %30, %cst_32 {dimension_numbers = #tpu.dot_dimension_numbers<[1], [0], [0], [1], [0, 0, 1, 1], [], []>} : vector<16x144xf32>, vector<144x128xf32>, vector<16x128xf32> -> vector<16x128xf32>
    %32 = arith.addf %27, %31 : vector<16x128xf32>
    %c0_33 = arith.constant 0 : index
    %c0_34 = arith.constant 0 : index
    %33 = vector.load %arg3[%c0_33, %c0_34] : memref<1x128xf32, #tpu.memory_space<vmem>>, vector<1x128xf32>
    %34 = vector.broadcast %33 : vector<1x128xf32> to vector<16x128xf32>
    %35 = arith.addf %32, %34 : vector<16x128xf32>
    %36 = vector.shape_cast %35 : vector<16x128xf32> to vector<1x16x128xf32>
    %c0_35 = arith.constant 0 : index
    %c0_36 = arith.constant 0 : index
    %c0_37 = arith.constant 0 : index
    %37 = vector.load %arg6[%c0_35, %c0_36, %c0_37] : memref<1x16x128xf32, #tpu.memory_space<vmem>>, vector<1x16x128xf32>
    tpu.vector_store %arg6[%c0_35, %c0_36, %c0_37], %36 {strides = array<i32>} : memref<1x16x128xf32, #tpu.memory_space<vmem>>, vector<1x16x128xf32>,
    %cst_38 = arith.constant dense<0.000000e+00> : vector<128xf32>
    %38 = vector.multi_reduction <add>, %35, %cst_38 [0] : vector<16x128xf32> to vector<128xf32>
    %39 = vector.shape_cast %38 : vector<128xf32> to vector<1x128xf32>
    %40 = vector.shape_cast %39 : vector<1x128xf32> to vector<1x1x128xf32>
    %c0_39 = arith.constant 0 : index
    %c0_40 = arith.constant 0 : index
    %c0_41 = arith.constant 0 : index
    %41 = vector.load %arg7[%c0_39, %c0_40, %c0_41] : memref<1x2x128xf32, #tpu.memory_space<vmem>>, vector<1x1x128xf32>
    tpu.vector_store %arg7[%c0_39, %c0_40, %c0_41], %40 {strides = array<i32>} : memref<1x2x128xf32, #tpu.memory_space<vmem>>, vector<1x1x128xf32>,
    %42 = arith.mulf %35, %35 : vector<16x128xf32>
    %cst_42 = arith.constant dense<0.000000e+00> : vector<128xf32>
    %43 = vector.multi_reduction <add>, %42, %cst_42 [0] : vector<16x128xf32> to vector<128xf32>
    %44 = vector.shape_cast %43 : vector<128xf32> to vector<1x128xf32>
    %45 = vector.shape_cast %44 : vector<1x128xf32> to vector<1x1x128xf32>
    %c0_43 = arith.constant 0 : index
    %c1_44 = arith.constant 1 : index
    %c0_45 = arith.constant 0 : index
    %46 = vector.load %arg7[%c0_43, %c1_44, %c0_45] : memref<1x2x128xf32, #tpu.memory_space<vmem>>, vector<1x1x128xf32>
    tpu.vector_store %arg7[%c0_43, %c1_44, %c0_45], %45 {strides = array<i32>} : memref<1x2x128xf32, #tpu.memory_space<vmem>>, vector<1x1x128xf32>,
    return
  }
  func.func @transform_0(%arg0: i32) -> (i32, i32, i32) {
    %c0_i32 = arith.constant 0 : i32
    %c0_i32_0 = arith.constant 0 : i32
    %c0_i32_1 = arith.constant 0 : i32
    return %arg0, %c0_i32, %c0_i32_0 : i32, i32, i32
  }
  func.func @transform_1(%arg0: i32) -> (i32, i32, i32) {
    %c0_i32 = arith.constant 0 : i32
    %c0_i32_0 = arith.constant 0 : i32
    %c0_i32_1 = arith.constant 0 : i32
    %c0_i32_2 = arith.constant 0 : i32
    return %c0_i32, %c0_i32_0, %c0_i32_1 : i32, i32, i32
  }
  func.func @transform_2(%arg0: i32) -> (i32, i32) {
    %c0_i32 = arith.constant 0 : i32
    %c0_i32_0 = arith.constant 0 : i32
    %c0_i32_1 = arith.constant 0 : i32
    return %c0_i32, %c0_i32_0 : i32, i32
  }
  func.func @transform_3(%arg0: i32) -> (i32, i32) {
    %c0_i32 = arith.constant 0 : i32
    %c0_i32_0 = arith.constant 0 : i32
    %c0_i32_1 = arith.constant 0 : i32
    return %c0_i32, %c0_i32_0 : i32, i32
  }
  func.func @transform_4(%arg0: i32) -> (i32, i32) {
    %c0_i32 = arith.constant 0 : i32
    %c0_i32_0 = arith.constant 0 : i32
    %c0_i32_1 = arith.constant 0 : i32
    return %c0_i32, %c0_i32_0 : i32, i32
  }
  func.func @transform_5(%arg0: i32) -> (i32, i32, i32) {
    %c0_i32 = arith.constant 0 : i32
    %c0_i32_0 = arith.constant 0 : i32
    %c0_i32_1 = arith.constant 0 : i32
    return %arg0, %c0_i32, %c0_i32_0 : i32, i32, i32
  }
  func.func @transform_6(%arg0: i32) -> (i32, i32, i32) {
    %c0_i32 = arith.constant 0 : i32
    %c0_i32_0 = arith.constant 0 : i32
    %c0_i32_1 = arith.constant 0 : i32
    return %arg0, %c0_i32, %c0_i32_0 : i32, i32, i32
  }
}

module attributes {stable_mosaic.version = 11 : i64} {
  func.func @bn_relu_kernel(%arg0: i32, %arg1: memref<1x16x128xf32, #tpu.memory_space<vmem>>, %arg2: memref<1x128xf32, #tpu.memory_space<vmem>>, %arg3: memref<1x128xf32, #tpu.memory_space<vmem>>, %arg4: memref<1x16x128xf32, #tpu.memory_space<vmem>>) attributes {dimension_semantics = [#tpu.dimension_semantics<parallel>], iteration_bounds = array<i64: 2>, scalar_prefetch = 0 : i64, scratch_operands = 0 : i64, tpu.core_type = #tpu.core_type<tc>, window_params = [{transform_indices = @transform_0, window_bounds = array<i64: 1, 16, 128>}, {pipeline_mode = #tpu.pipeline_mode<synchronous>, transform_indices = @transform_1, window_bounds = array<i64: 1, 128>}, {pipeline_mode = #tpu.pipeline_mode<synchronous>, transform_indices = @transform_2, window_bounds = array<i64: 1, 128>}, {transform_indices = @transform_3, window_bounds = array<i64: 1, 16, 128>}]} {
    %c0 = arith.constant 0 : index
    %c0_0 = arith.constant 0 : index
    %c0_1 = arith.constant 0 : index
    %0 = vector.load %arg1[%c0, %c0_0, %c0_1] : memref<1x16x128xf32, #tpu.memory_space<vmem>>, vector<1x16x128xf32>
    %c0_2 = arith.constant 0 : index
    %c0_3 = arith.constant 0 : index
    %1 = vector.load %arg2[%c0_2, %c0_3] : memref<1x128xf32, #tpu.memory_space<vmem>>, vector<1x128xf32>
    %2 = vector.shape_cast %1 : vector<1x128xf32> to vector<1x1x128xf32>
    %3 = vector.broadcast %2 : vector<1x1x128xf32> to vector<1x16x128xf32>
    %4 = arith.mulf %0, %3 : vector<1x16x128xf32>
    %c0_4 = arith.constant 0 : index
    %c0_5 = arith.constant 0 : index
    %5 = vector.load %arg3[%c0_4, %c0_5] : memref<1x128xf32, #tpu.memory_space<vmem>>, vector<1x128xf32>
    %6 = vector.shape_cast %5 : vector<1x128xf32> to vector<1x1x128xf32>
    %7 = vector.broadcast %6 : vector<1x1x128xf32> to vector<1x16x128xf32>
    %8 = arith.addf %4, %7 : vector<1x16x128xf32>
    %cst = arith.constant 0.000000e+00 : f32
    %9 = vector.broadcast %cst : f32 to vector<1x16x128xf32>
    %10 = arith.maximumf %8, %9 : vector<1x16x128xf32>
    %c0_6 = arith.constant 0 : index
    %c0_7 = arith.constant 0 : index
    %c0_8 = arith.constant 0 : index
    %11 = vector.load %arg4[%c0_6, %c0_7, %c0_8] : memref<1x16x128xf32, #tpu.memory_space<vmem>>, vector<1x16x128xf32>
    tpu.vector_store %arg4[%c0_6, %c0_7, %c0_8], %10 {strides = array<i32>} : memref<1x16x128xf32, #tpu.memory_space<vmem>>, vector<1x16x128xf32>,
    return
  }
  func.func @transform_0(%arg0: i32) -> (i32, i32, i32) {
    %c0_i32 = arith.constant 0 : i32
    %c0_i32_0 = arith.constant 0 : i32
    %c0_i32_1 = arith.constant 0 : i32
    return %arg0, %c0_i32, %c0_i32_0 : i32, i32, i32
  }
  func.func @transform_1(%arg0: i32) -> (i32, i32) {
    %c0_i32 = arith.constant 0 : i32
    %c0_i32_0 = arith.constant 0 : i32
    %c0_i32_1 = arith.constant 0 : i32
    return %c0_i32, %c0_i32_0 : i32, i32
  }
  func.func @transform_2(%arg0: i32) -> (i32, i32) {
    %c0_i32 = arith.constant 0 : i32
    %c0_i32_0 = arith.constant 0 : i32
    %c0_i32_1 = arith.constant 0 : i32
    return %c0_i32, %c0_i32_0 : i32, i32
  }
  func.func @transform_3(%arg0: i32) -> (i32, i32, i32) {
    %c0_i32 = arith.constant 0 : i32
    %c0_i32_0 = arith.constant 0 : i32
    %c0_i32_1 = arith.constant 0 : i32
    return %arg0, %c0_i32, %c0_i32_0 : i32, i32, i32
  }
}

</mosaic_0001>

<bundles_post_ra>
// kernel: tile.33
= control target key start
LH: loop header
LB: loop body
LE: loop exit
PB: predicated region body
PF: predicated region fallthrough
CT: control target
= control target key end

     0   :  { %s28_s0 = inlined_call_operand.vmem [shape: f32[8], index: 0, kind: input, shape index: {}]   ;;  %s29_s1 = inlined_call_operand.vmem [shape: f32[16,8], index: 1, kind: output, shape index: {}]  }
   0x1   :  { %v4_v0 = vld [vmem:[%s28_s0] ss:$0 sm:$0xff] }
   0x2   :  { %5 = vst [vmem:[%s29_s1] sm:$0xff] %v4_v0 }
   0x3   :  { %8 = vst [vmem:[%s29_s1 + $0x8] sm:$0xff] %v4_v0 }

// kernel: tile.34
= control target key start
LH: loop header
LB: loop body
LE: loop exit
PB: predicated region body
PF: predicated region fallthrough
CT: control target
= control target key end

     0   :  { %s131_s10 = smov 120   ;;  %s132_s11 = smov 104   ;;  %vm3_vm0 = vcmask 64512   ;;  %vm9_vm1 = vcmask 1048512   ;;  %vm15_vm2 = vcmask 982912   ;;  %vm21_vm3 = vcmask 917312   ;;  %s207_s0 = inlined_call_operand.vmem [shape: f32[16,8], index: 0, kind: input, shape index: {}]   ;;  %s208_s1 = inlined_call_operand.vmem [shape: f32[1,128], index: 1, kind: output, shape index: {}]  }
   0x1   :  { %v101_v0 = vld [vmem:[%s207_s0 + $0xf] sm:$0x1]   ;;  %v103_v1 = vld [vmem:[%s207_s0 + $0xd] sm:$0x1]   ;;  %v105_v2 = vld [vmem:[%s207_s0 + $0xb] sm:$0x1]  }
   0x2   :  { %7 = vrot.lane.b32.xlu0 %v101_v0, %s131_s10  ;;  %19 = vrot.lane.b32.xlu1 %v103_v1, %s132_s11  ;;  %s133_s14 = smov 88   ;;  %v102_v3 = vld [vmem:[%s207_s0 + $0xe] sm:$0x1]   ;;  %v104_v4 = vld [vmem:[%s207_s0 + $0xc] sm:$0x1]   ;;  %s134_s19 = smov 112  }
   0x3   :  { %31 = vrot.lane.b32.xlu2 %v105_v2, %s133_s14  ;;  %s135_s20 = smov 96   ;;  %v106_v5 = vld [vmem:[%s207_s0 + $0xa] sm:$0x1]   ;;  %s136_s23 = smov 80   ;;  %v107_v6 = vld [vmem:[%s207_s0 + $0x9] sm:$0x1]  }
   0x4   :  { %v108_v7 = vld [vmem:[%s207_s0 + $0x8] sm:$0x1]   ;;  %s137_s28 = smov 72   ;;  %s138_s29 = smov 64   ;;  %v109_v8 = vld [vmem:[%s207_s0 + $0x7] sm:$0x1]  }
   0x5   :  { %s139_s3 = smov 56   ;;  %v110_v9 = vld [vmem:[%s207_s0 + $0x6] sm:$0x1]   ;;  %v111_v10 = vld [vmem:[%s207_s0 + $0x5] sm:$0x1]   ;;  %s140_s8 = smov 48  }
   0x6   :  { %s141_s9 = smov 40   ;;  %v112_v11 = vld [vmem:[%s207_s0 + $0x4] sm:$0x1]   ;;  %s142_s12 = smov 32   ;;  %v113_v12 = vld [vmem:[%s207_s0 + $0x3] sm:$0x1]  }
   0x7   :  { %v114_v13 = vld [vmem:[%s207_s0 + $0x2] sm:$0x1]   ;;  %s143_s17 = smov 24   ;;  %s144_s18 = smov 16   ;;  %v115_v14 = vld [vmem:[%s207_s0 + $0x1] sm:$0x1]  }
   0x8   :  { %s145_s21 = smov 8   ;;  %v2_v15 = vld [vmem:[%s207_s0] sm:$0x1]   ;;  %vm27_vm4 = vcmask 851712   ;;  %vm33_vm5 = vcmask 786112   ;;  %vm39_vm6 = vcmask 720512  }
   0x9   :  { %4 = vst.msk [vmem:[#allocation0] sm:$0x1] %vm3_vm0, %v2_v15   ;;  %vm45_vm7 = vcmask 654912   ;;  %vm51_vm8 = vcmask 589312   ;;  %vm57_vm9 = vcmask 523712   ;;  %vm63_vm10 = vcmask 458112  }
   0xa   :  { %13 = vrot.lane.b32.xlu0 %v102_v3, %s134_s19  ;;  %25 = vrot.lane.b32.xlu1 %v104_v4, %s135_s20  ;;  %vm69_vm11 = vcmask 392512   ;;  %vm75_vm12 = vcmask 326912   ;;  %vm81_vm13 = vcmask 261312   ;;  %vm87_vm14 = vcmask 195712  }
   0xb   :  { %37 = vrot.lane.b32.xlu2 %v106_v5, %s136_s23  ;;  %vm93_vm15 = vcmask 130112  }
  0x12   :  { %43 = vrot.lane.b32.xlu0 %v107_v6, %s137_s28  ;;  %49 = vrot.lane.b32.xlu1 %v108_v7, %s138_s29 }
  0x13   :  { %55 = vrot.lane.b32.xlu2 %v109_v8, %s139_s3 }
  0x1a   :  { %61 = vrot.lane.b32.xlu0 %v110_v9, %s140_s8  ;;  %67 = vrot.lane.b32.xlu1 %v111_v10, %s141_s9 }
  0x1b   :  { %73 = vrot.lane.b32.xlu2 %v112_v11, %s142_s12 }
  0x22   :  { %79 = vrot.lane.b32.xlu0 %v113_v12, %s143_s17  ;;  %85 = vrot.lane.b32.xlu1 %v114_v13, %s144_s18 }
  0x23   :  { %91 = vrot.lane.b32.xlu2 %v115_v14, %s145_s21 }
  0x5d   :  { %v32_v16 = vpop.permute.xlu2 %31  }
  0x65   :  { %v38_v17 = vpop.permute.xlu2 %37  }
  0x6d   :  { %v56_v18 = vpop.permute.xlu2 %55  }
  0x74   :  { %v8_v19 = vpop.permute.xlu0 %7   ;;  %v20_v20 = vpop.permute.xlu1 %19  }
  0x75   :  { %10 = vst.msk [vmem:[#allocation0] sm:$0x1] %vm9_vm1, %v8_v19   ;;  %v74_v21 = vpop.permute.xlu2 %73  }
  0x7c   :  { %v14_v22 = vpop.permute.xlu0 %13   ;;  %v26_v23 = vpop.permute.xlu1 %25  }
  0x7d   :  { %16 = vst.msk [vmem:[#allocation0] sm:$0x1] %vm15_vm2, %v14_v22   ;;  %v92_v24 = vpop.permute.xlu2 %91  }
  0x7e   :  { %22 = vst.msk [vmem:[#allocation0] sm:$0x1] %vm21_vm3, %v20_v20  }
  0x7f   :  { %28 = vst.msk [vmem:[#allocation0] sm:$0x1] %vm27_vm4, %v26_v23  }
  0x80   :  { %34 = vst.msk [vmem:[#allocation0] sm:$0x1] %vm33_vm5, %v32_v16  }
  0x81   :  { %40 = vst.msk [vmem:[#allocation0] sm:$0x1] %vm39_vm6, %v38_v17  }
  0x84   :  { %v44_v25 = vpop.permute.xlu0 %43   ;;  %v50_v26 = vpop.permute.xlu1 %49  }
  0x85   :  { %46 = vst.msk [vmem:[#allocation0] sm:$0x1] %vm45_vm7, %v44_v25  }
  0x86   :  { %52 = vst.msk [vmem:[#allocation0] sm:$0x1] %vm51_vm8, %v50_v26  }
  0x87   :  { %58 = vst.msk [vmem:[#allocation0] sm:$0x1] %vm57_vm9, %v56_v18  }
  0x8c   :  { %v62_v27 = vpop.permute.xlu0 %61   ;;  %v68_v28 = vpop.permute.xlu1 %67  }
  0x8d   :  { %64 = vst.msk [vmem:[#allocation0] sm:$0x1] %vm63_vm10, %v62_v27  }
  0x8e   :  { %70 = vst.msk [vmem:[#allocation0] sm:$0x1] %vm69_vm11, %v68_v28  }
  0x8f   :  { %76 = vst.msk [vmem:[#allocation0] sm:$0x1] %vm75_vm12, %v74_v21  }
  0x94   :  { %v80_v29 = vpop.permute.xlu0 %79   ;;  %v86_v30 = vpop.permute.xlu1 %85  }
  0x95   :  { %82 = vst.msk [vmem:[#allocation0] sm:$0x1] %vm81_vm13, %v80_v29  }
  0x96   :  { %88 = vst.msk [vmem:[#allocation0] sm:$0x1] %vm87_vm14, %v86_v30  }
  0x97   :  { %94 = vst.msk [vmem:[#allocation0] sm:$0x1] %vm93_vm15, %v92_v24  }
  0x9e   :  { %v97_v31 = vld [vmem:[#allocation0] sm:$0x1] }
  0x9f   :  { %100 = vst [vmem:[%s208_s1] sm:$0x1] %v97_v31 }

// kernel: double_conv_forward.3
= control target key start
LH: loop header
LB: loop body
LE: loop exit
PB: predicated region body
PF: predicated region fallthrough
CT: control target
= control target key end

     0   :  { %s625_s21 = smov 0   ;;  %s741_s0 = inlined_call_operand.vmem [shape: f32[2,16,64], index: 0, kind: input, shape index: {}]   ;;  %s742_s1 = inlined_call_operand.vmem [shape: f32[3,72,128], index: 1, kind: input, shape index: {}]   ;;  %s743_s2 = inlined_call_operand.vmem [shape: f32[1,128], index: 2, kind: input, shape index: {}]   ;;  %s744_s3 = inlined_call_operand.vmem [shape: f32[1,64], index: 3, kind: input, shape index: {}]   ;;  %s745_s4 = inlined_call_operand.vmem [shape: f32[1,64], index: 4, kind: input, shape index: {}]   ;;  %s746_s5 = inlined_call_operand.vmem [shape: f32[2,16,128], index: 5, kind: output, shape index: {0}]   ;;  %s747_s6 = inlined_call_operand.vmem [shape: f32[2,2,128], index: 6, kind: output, shape index: {1}]  }
   0x1 LB: > { %s522_s3 = sadd.s32 4294967295, %s586_s21   ;;  %p526_p0 = scmp.ge.s32.totalorder %s586_s21, 1  ;;  %s586_s21 = sphi %s625_s21, %s17_s21  }
   0x2   : > { %p215_p1 = scmp.lt.s32.totalorder %s586_s21, 3 }
   0x4   : > { %p216_p2 = pnand %p526_p0, %p215_p1 }
   0x5   : > { %p249_p3 = scmp.lt.s32.totalorder (!%p216_p2), %s522_s3, 1  ;;  %s589_s4 = smov (!%p216_p2), 4  }
   0x6   : > { %219 = sbr.rel (%p216_p2) target bundleno = 311 (0x137), region = 40 }
   0xb   : > { %v540_v0 = vld [vmem:[%s742_s1 + $0x88] sm:$0xff]  ;;  %v295_v1 = vld [vmem:[%s742_s1 + $0x40] sm:$0xff]  ;;  %vm265_vm0 = vcmask 581632   ;;  %v294_v3 = vld [vmem:[%s742_s1 + $0x38] sm:$0xff]  ;;  %vm268_vm1 = vcmask 31744   ;;  %s749_s3 = smov (!%p249_p3, %s522_s3), 1 }
   0xc   : > { %v539_v2 = vld [vmem:[%s742_s1 + $0x80] sm:$0xff]  ;;  %322 = vmatpush.msra.mxu0 %v540_v0  ;;  %351 = vmatpush.msra.mxu1 %v295_v1  ;;  %v538_v4 = vld [vmem:[%s742_s1 + $0x78] sm:$0xff]  ;;  %v293_v5 = vld [vmem:[%s742_s1 + $0x30] sm:$0xff]  ;;  %v588_v6 = vmov 0.0   ;;  %vm271_vm2 = vcmask 589344   ;;  %s558_s11 = sshll.u32 %s749_s3, 4 }
   0xd   : > { %560 = vmatpush.msra.mxu3 %v540_v0  ;;  %266 = vst.msk [vmem:[#allocation2] sm:$0x1] %vm265_vm0, %v588_v6  ;;  %v553_v7 = vld [vmem:[%s742_s1 + $0xd0] sm:$0xff]  ;;  %s253_s16 = scalar_lea.vmem %s741_s0, %s558_s11  ;;  %v292_v9 = vld [vmem:[%s742_s1 + $0x28] sm:$0xff]  ;;  %v291_v12 = vld [vmem:[%s742_s1 + $0x20] sm:$0xff]  ;;  %vm282_vm3 = vcmask 556064   ;;  %s258_s14 = scalar_lea.vmem %s746_s5, %s558_s11 }
   0xe   : > { %323 = vmatpush.msra.mxu0 %v539_v2  ;;  %352 = vmatpush.msra.mxu1 %v294_v3  ;;  %267 = vst.msk [vmem:[#allocation2 + $0x11] sm:$0x1] %vm265_vm0, %v588_v6  ;;  %v537_v8 = vld [vmem:[%s742_s1 + $0x70] sm:$0xff]  ;;  %v263_v10 = vld [vmem:[%s253_s16] sm:$0xff]  ;;  %v536_v11 = vld [vmem:[%s742_s1 + $0x68] sm:$0xff]  ;;  %vm308_vm4 = vcmask 588800  }
   0xf   : > { %392 = vmatpush.msra.mxu2 %v553_v7  ;;  %269 = vst.msk [vmem:[#allocation2 + $0x1] sm:$0xff] %vm268_vm1, %v588_v6  ;;  %561 = vmatpush.msra.mxu3 %v539_v2  ;;  %v264_v13 = vld [vmem:[%s253_s16 + $0x8] sm:$0xff]  ;;  %v535_v14 = vld [vmem:[%s742_s1 + $0x60] sm:$0xff]  ;;  %v290_v15 = vld [vmem:[%s742_s1 + $0x18] sm:$0xff]  ;;  %s531_s11 = sshll.u32 %s749_s3, 1 }
  0x10   : > { %324 = vmatpush.msra.mxu0 %v538_v4  ;;  %353 = vmatpush.msra.mxu1 %v293_v5  ;;  %272 = vst.msk [vmem:[#allocation2 + $0x1] sm:$0xff] %vm271_vm2, %v588_v6  ;;  %v552_v16 = vld [vmem:[%s742_s1 + $0xc8] sm:$0xff]  ;;  %v534_v17 = vld [vmem:[%s742_s1 + $0x58] sm:$0xff]  ;;  %v289_v18 = vld [vmem:[%s742_s1 + $0x10] sm:$0xff]  ;;  %s262_s17 = scalar_lea.vmem %s747_s6, %s531_s11 }
  0x11   : > { %270 = vst.msk [vmem:[#allocation2 + $0x9] sm:$0xff] %vm268_vm1, %v588_v6  ;;  %562 = vmatpush.msra.mxu3 %v538_v4  ;;  %276 = vrot.lane.b32.xlu0 %v263_v10, %s589_s4  ;;  %v551_v19 = vld [vmem:[%s742_s1 + $0xc0] sm:$0xff]  ;;  %v533_v20 = vld [vmem:[%s742_s1 + $0x50] sm:$0xff]  ;;  %v288_v21 = vld [vmem:[%s742_s1 + $0x8] sm:$0xff] }
  0x12   : > { %325 = vmatpush.msra.mxu0 %v537_v8  ;;  %273 = vst.msk [vmem:[#allocation2 + $0x9] sm:$0xff] %vm271_vm2, %v588_v6  ;;  %354 = vmatpush.msra.mxu1 %v292_v9  ;;  %v550_v22 = vld [vmem:[%s742_s1 + $0xb8] sm:$0xff]  ;;  %v532_v23 = vld [vmem:[%s742_s1 + $0x48] sm:$0xff]  ;;  %v287_v24 = vld [vmem:[%s742_s1] sm:$0xff] }
  0x13   : > { %563 = vmatpush.msra.mxu3 %v537_v8  ;;  %393 = vmatpush.msra.mxu2 %v552_v16  ;;  %v549_v25 = vld [vmem:[%s742_s1 + $0xb0] sm:$0xff]  ;;  %v548_v26 = vld [vmem:[%s742_s1 + $0xa8] sm:$0xff]  ;;  %v547_v27 = vld [vmem:[%s742_s1 + $0xa0] sm:$0xff] }
  0x14   : > { %326 = vmatpush.msra.mxu0 %v536_v11  ;;  %355 = vmatpush.msra.mxu1 %v291_v12  ;;  %v546_v28 = vld [vmem:[%s742_s1 + $0x98] sm:$0xff]  ;;  %v545_v29 = vld [vmem:[%s742_s1 + $0x90] sm:$0xff]  ;;  %v579_v41 = vld [vmem:[%s743_s2] ss:$0 sm:$0xff] }
  0x15   : > { %564 = vmatpush.msra.mxu3 %v536_v11  ;;  %394 = vmatpush.msra.mxu2 %v551_v19 }
  0x16   : > { %327 = vmatpush.msra.mxu0 %v535_v14  ;;  %356 = vmatpush.msra.mxu1 %v290_v15 }
  0x17   : > { %565 = vmatpush.msra.mxu3 %v535_v14  ;;  %395 = vmatpush.msra.mxu2 %v550_v22 }
  0x18   : > { %328 = vmatpush.msra.mxu0 %v534_v17  ;;  %357 = vmatpush.msra.mxu1 %v289_v18 }
  0x19   : > { %278 = vrot.lane.b32.xlu0 %v264_v13, %s589_s4  ;;  %566 = vmatpush.msra.mxu3 %v534_v17 }
  0x1a   : > { %329 = vmatpush.msra.mxu0 %v533_v20  ;;  %358 = vmatpush.msra.mxu1 %v288_v21 }
  0x1b   : > { %567 = vmatpush.msra.mxu3 %v533_v20  ;;  %396 = vmatpush.msra.mxu2 %v549_v25 }
  0x1c   : > { %330 = vmatpush.msra.mxu0 %v532_v23  ;;  %359 = vmatpush.msra.mxu1 %v287_v24 }
  0x1d   : > { %568 = vmatpush.msra.mxu3 %v532_v23  ;;  %397 = vmatpush.msra.mxu2 %v548_v26 }
  0x1f   : > { %398 = vmatpush.msra.mxu2 %v547_v27 }
  0x21   : > { %399 = vmatpush.msra.mxu2 %v546_v28 }
  0x23   : > { %400 = vmatpush.msra.mxu2 %v545_v29 }
  0x83   : > { %v277_v30 = vpop.permute.xlu0 %276 }
  0x84   : > { %283 = vst.msk [vmem:[#allocation2 + $0x1] sm:$0xff] %vm282_vm3, %v277_v30 }
  0x8b   : > { %v279_v31 = vpop.permute.xlu0 %278  ;;  %v296_v32 = vld [vmem:[#allocation2 + $0x1] sm:$0xff] }
  0x8c   : > { %v285_v33 = vld [vmem:[#allocation2] sm:$0xff]  ;;  %284 = vst.msk [vmem:[#allocation2 + $0x9] sm:$0xff] %vm282_vm3, %v279_v31  ;;  %541 = vmatmul.msk.f32.vlgmr.msra.gmra.mxu0 %vm308_vm4, %v296_v32 }
  0x8d   : > { %543 = vmatmul.msk.f32.vlgmr.msra.gmra.mxu1 %vm308_vm4, %v285_v33 }
  0x93   : > { %v297_v34 = vld [vmem:[#allocation2 + $0x9] sm:$0xff] }
  0x94   : > { %v286_v35 = vld [vmem:[#allocation2 + $0x8] sm:$0xff]  ;;  %542 = vmatmul.msk.f32.vlgmr.msra.gmra.mxu3 %vm308_vm4, %v297_v34 }
  0x95   : > { %v367_v36 = vld [vmem:[#allocation2 + $0x2] sm:$0xff]  ;;  %544 = vmatmul.msk.f32.gmra.mxu1 %vm308_vm4, %v286_v35  ;;  %v368_v37 = vld [vmem:[#allocation2 + $0xa] sm:$0xff] }
  0x96   : > { %554 = vmatmul.msk.f32.vlgmr.msra.gmra.mxu2 %vm308_vm4, %v367_v36 }
  0x9e   : > { %555 = vmatmul.msk.f32.gmra.mxu2 %vm308_vm4, %v368_v37 }
 0x109   : > { %v332_v38 = vpop.f32.mrf.mxu0 }
 0x10a   : > { %v361_v39 = vpop.f32.mrf.mxu1 }
 0x10b   : > { %v362_v40 = vadd.f32 %v361_v39, %v332_v38 }
 0x112   : > { %v364_v46 = vpop.f32.mrf.mxu1 }
 0x117   : > { %v335_v45 = vpop.f32.mrf.mxu3 }
 0x118   : > { %v365_v47 = vadd.f32 %v364_v46, %v335_v45 }
 0x119   : > { %v402_v42 = vpop.f32.mrf.mxu2 }
 0x11a   : > { %v408_v43 = vadd.f32 %v402_v42, %v362_v40 }
 0x11c   : > { %v414_v44 = vadd.f32 %v579_v41, %v408_v43 }
 0x11e   : > { %416 = vst [vmem:[%s258_s14] sm:$0xff] %v414_v44  ;;  %v426_v51 = vmul.f32 %v414_v44, %v414_v44 }
 0x121   : > { %v405_v48 = vpop.f32.mrf.mxu2 }
 0x122   : > { %v409_v49 = vadd.f32 %v405_v48, %v365_v47 }
 0x124   : > { %v415_v50 = vadd.f32 %v579_v41, %v409_v49 }
 0x126   : > { %417 = vst [vmem:[%s258_s14 + $0x8] sm:$0xff] %v415_v50  ;;  %v418_v52 = vadd.f32 %v415_v50, %v414_v44  ;;  %v427_v53 = vmul.f32 %v415_v50, %v415_v50 }
 0x128   : > { %v419_v54 = vrot.slane %v418_v52, 4  ;;  %v428_v55 = vadd.f32 %v427_v53, %v426_v51 }
 0x12a   : > { %v420_v56 = vadd.f32 %v419_v54, %v418_v52  ;;  %v429_v57 = vrot.slane %v428_v55, 4 }
 0x12c   : > { %v421_v58 = vrot.slane %v420_v56, 2  ;;  %v430_v59 = vadd.f32 %v429_v57, %v428_v55 }
 0x12e   : > { %v422_v60 = vadd.f32 %v421_v58, %v420_v56  ;;  %v431_v61 = vrot.slane %v430_v59, 2 }
 0x130   : > { %v423_v62 = vrot.slane %v422_v60, 1  ;;  %v432_v63 = vadd.f32 %v431_v61, %v430_v59 }
 0x132   : > { %v424_v0 = vadd.f32 %v423_v62, %v422_v60  ;;  %v433_v1 = vrot.slane %v432_v63, 1 }
 0x134   : > { %425 = vst [vmem:[%s262_s17] sm:$0x1] %v424_v0  ;;  %v434_v2 = vadd.f32 %v433_v1, %v432_v63 }
 0x136   : > { %435 = vst [vmem:[%s262_s17 + $0x1] sm:$0x1] %v434_v2 }
 0x137 PF: > { %s17_s21 = sadd.s32 1, %s586_s21  }
 0x138   : > { %p14_p4 = scmp.ge.s32.totalorder %s17_s21, 4  }
 0x13a   :  { %16 = sbr.rel (!%p14_p4) target bundleno = 1 (0x1), region = 84 }

// kernel: double_conv_forward.4
= control target key start
LH: loop header
LB: loop body
LE: loop exit
PB: predicated region body
PF: predicated region fallthrough
CT: control target
= control target key end

     0   :  { %s808_s21 = smov 0   ;;  %s1043_s0 = inlined_call_operand.vmem [shape: f32[2,16,128], index: 0, kind: input, shape index: {}]   ;;  %s1044_s1 = inlined_call_operand.vmem [shape: f32[3,144,128], index: 1, kind: input, shape index: {}]   ;;  %s1045_s2 = inlined_call_operand.vmem [shape: f32[1,128], index: 2, kind: input, shape index: {}]   ;;  %s1046_s3 = inlined_call_operand.vmem [shape: f32[1,128], index: 3, kind: input, shape index: {}]   ;;  %s1047_s4 = inlined_call_operand.vmem [shape: f32[1,128], index: 4, kind: input, shape index: {}]   ;;  %s1048_s5 = inlined_call_operand.vmem [shape: f32[2,16,128], index: 5, kind: output, shape index: {0}]   ;;  %s1049_s6 = inlined_call_operand.vmem [shape: f32[2,2,128], index: 6, kind: output, shape index: {1}]  }
   0x1 LB: > { %s694_s22 = sadd.s32 4294967295, %s769_s21   ;;  %p698_p0 = scmp.ge.s32.totalorder %s769_s21, 1  ;;  %s769_s21 = sphi %s808_s21, %s17_s21  }
   0x2   : > { %p215_p1 = scmp.lt.s32.totalorder %s769_s21, 3 }
   0x4   : > { %p216_p2 = pnand %p698_p0, %p215_p1 }
   0x5   : > { %p249_p3 = scmp.lt.s32.totalorder (!%p216_p2), %s694_s22, 1 }
   0x6   : > { %219 = sbr.rel (%p216_p2) target bundleno = 333 (0x14d), region = 40 }
   0xb   : > { %v343_v0 = vld [vmem:[%s1044_s1 + $0x78] sm:$0xff]  ;;  %s1053_s22 = smov (!%p249_p3, %s694_s22), 1  ;;  %v760_v1 = vld [vmem:[%s1046_s3] ss:$0 sm:$0xff]  ;;  %v342_v2 = vld [vmem:[%s1044_s1 + $0x70] sm:$0xff]  ;;  %vm288_vm0 = vcmask 64513   ;;  %v279_v32 = vlaneseq }
   0xc   : > { %444 = vmatpush.msra.mxu2 %v343_v0  ;;  %v341_v3 = vld [vmem:[%s1044_s1 + $0x68] sm:$0xff]  ;;  %v771_v5 = vmov 0.0   ;;  %vm294_vm1 = vcmask 130113   ;;  %s748_s9 = sshll.u32 %s1053_s22, 4  ;;  %v718_v6 = vld [vmem:[%s1044_s1 + $0x100] sm:$0xff]  ;;  %v717_v9 = vld [vmem:[%s1044_s1 + $0xf8] sm:$0xff] }
   0xd   : > { %v719_v4 = vld [vmem:[%s1044_s1 + $0x108] sm:$0xff]  ;;  %289 = vst.msk [vmem:[#allocation2] sm:$0xfe] %vm288_vm0, %v771_v5  ;;  %s253_s14 = scalar_lea.vmem %s1043_s0, %s748_s9  ;;  %v761_v7 = vld [vmem:[%s1047_s4] ss:$0 sm:$0xff]  ;;  %v339_v14 = vld [vmem:[%s1044_s1 + $0x58] sm:$0xff]  ;;  %s258_s15 = scalar_lea.vmem %s1048_s5, %s748_s9 }
   0xe   : > { %445 = vmatpush.msra.mxu2 %v342_v2  ;;  %393 = vmatpush.msra.mxu0 %v719_v4  ;;  %v340_v8 = vld [vmem:[%s1044_s1 + $0x60] sm:$0xff]  ;;  %295 = vst.msk [vmem:[#allocation2 + $0x8] sm:$0xfe] %vm294_vm1, %v771_v5  ;;  %v264_v11 = vld [vmem:[%s253_s14 + $0x8] sm:$0xff]  ;;  %v716_v15 = vld [vmem:[%s1044_s1 + $0xf0] sm:$0xff]  ;;  %vm302_vm2 = vcmask 1040384  }
   0xf   : > { %v263_v10 = vld [vmem:[%s253_s14] sm:$0xff]  ;;  %v270_v13 = vmul.f32 %v760_v1, %v264_v11  ;;  %v338_v18 = vld [vmem:[%s1044_s1 + $0x50] sm:$0xff]  ;;  %v715_v19 = vld [vmem:[%s1044_s1 + $0xe8] sm:$0xff]  ;;  %s772_s14 = smov 8   ;;  %vm292_vm3 = vcmask 57344   ;;  %vm298_vm4 = vcmask 122944  }
  0x10   : > { %446 = vmatpush.msra.mxu2 %v341_v3  ;;  %394 = vmatpush.msra.mxu0 %v718_v6  ;;  %v269_v12 = vmul.f32 %v760_v1, %v263_v10  ;;  %v337_v22 = vld [vmem:[%s1044_s1 + $0x48] sm:$0xff]  ;;  %v714_v23 = vld [vmem:[%s1044_s1 + $0xe0] sm:$0xff]  ;;  %v335_v27 = vld [vmem:[%s1044_s1 + $0x38] sm:$0xff]  ;;  %293 = vst.msk [vmem:[#allocation2 + $0x20] sm:$0x1] %vm292_vm3, %v771_v5  ;;  %vm910_vm5 = vcmp.lt.s32.totalorder %v279_v32, 144 }
  0x11   : > { %v276_v17 = vadd.f32 %v761_v7, %v270_v13  ;;  %v336_v26 = vld [vmem:[%s1044_s1 + $0x40] sm:$0xff]  ;;  %v334_v28 = vld [vmem:[%s1044_s1 + $0x30] sm:$0xff]  ;;  %v333_v29 = vld [vmem:[%s1044_s1 + $0x28] sm:$0xff]  ;;  %299 = vst.msk [vmem:[#allocation2 + $0x28] sm:$0x1] %vm298_vm4, %v771_v5  ;;  %vm290_vm6 = vcmask 64512  }
  0x12   : > { %447 = vmatpush.msra.mxu2 %v340_v8  ;;  %395 = vmatpush.msra.mxu0 %v717_v9  ;;  %v275_v16 = vadd.f32 %v761_v7, %v269_v12  ;;  %v332_v31 = vld [vmem:[%s1044_s1 + $0x20] sm:$0xff]  ;;  %v713_v33 = vld [vmem:[%s1044_s1 + $0xd8] sm:$0xff]  ;;  %v712_v36 = vld [vmem:[%s1044_s1 + $0xd0] sm:$0xff]  ;;  %291 = vst.msk [vmem:[#allocation2 + $0x10] sm:$0xff] %vm290_vm6, %v771_v5  ;;  %vm296_vm7 = vcmask 130112   ;;  %vm315_vm8 = vcmask 1047617  }
  0x13   : > { %v278_v21 = vmax.f32 %v276_v17, 0.0  ;;  %v721_v34 = vld [vmem:[%s1044_s1 + $0x118] sm:$0xff]  ;;  %v720_v37 = vld [vmem:[%s1044_s1 + $0x110] sm:$0xff]  ;;  %v711_v39 = vld [vmem:[%s1044_s1 + $0xc8] sm:$0xff]  ;;  %297 = vst.msk [vmem:[#allocation2 + $0x18] sm:$0xff] %vm296_vm7, %v771_v5  ;;  %vm321_vm9 = vcmask 1040448  }
  0x14   : > { %448 = vmatpush.msra.mxu2 %v339_v14  ;;  %396 = vmatpush.msra.mxu0 %v716_v15  ;;  %v277_v20 = vmax.f32 %v275_v16, 0.0  ;;  %v331_v35 = vld [vmem:[%s1044_s1 + $0x18] sm:$0xff]  ;;  %v330_v38 = vld [vmem:[%s1044_s1 + $0x10] sm:$0xff]  ;;  %v329_v42 = vld [vmem:[%s1044_s1 + $0x8] sm:$0xff]  ;;  %vm318_vm10 = vcmask 1047616   ;;  %vm388_vm11 = vcmask 130048  }
  0x15   : > { %v304_v25 = vrot.slane %v278_v21, 7  ;;  %430 = vmatpush.msra.mxu1 %v721_v34  ;;  %v741_v41 = vld [vmem:[%s1044_s1 + $0x198] sm:$0xff]  ;;  %v345_v43 = vld [vmem:[%s1044_s1 + $0x88] sm:$0xff]  ;;  %v710_v44 = vld [vmem:[%s1044_s1 + $0xc0] sm:$0xff]  ;;  %vm375_vm12 = vcmask 1046528   ;;  %vm517_vm13 = vcmask 1045504  }
  0x16   : > { %449 = vmatpush.msra.mxu2 %v338_v18  ;;  %397 = vmatpush.msra.mxu0 %v715_v19  ;;  %v303_v24 = vrot.slane %v277_v20, 7  ;;  %v740_v45 = vld [vmem:[%s1044_s1 + $0x190] sm:$0xff]  ;;  %v328_v46 = vld [vmem:[%s1044_s1] sm:$0xff]  ;;  %283 = vst.msk [vmem:[#allocation2] ss:$8 sm:$0x3] %vm910_vm5, %v771_v5 }
  0x17   : > { %310 = vrot.lane.b32.xlu1 %v304_v25, %s772_s14  ;;  %431 = vmatpush.msra.mxu1 %v720_v37  ;;  %v344_v47 = vld [vmem:[%s1044_s1 + $0x80] sm:$0xff]  ;;  %286 = vst.msk [vmem:[#allocation2 + $0x21] ss:$8 sm:$0x3] %vm910_vm5, %v771_v5  ;;  %v709_v48 = vld [vmem:[%s1044_s1 + $0xb8] sm:$0xff]  ;;  %v739_v49 = vld [vmem:[%s1044_s1 + $0x188] sm:$0xff] }
  0x18   : > { %450 = vmatpush.msra.mxu2 %v337_v22  ;;  %398 = vmatpush.msra.mxu0 %v714_v23  ;;  %v305_v30 = vsel %vm302_vm2, %v303_v24, %v304_v25  ;;  %v708_v50 = vld [vmem:[%s1044_s1 + $0xb0] sm:$0xff]  ;;  %v738_v51 = vld [vmem:[%s1044_s1 + $0x180] sm:$0xff]  ;;  %v707_v52 = vld [vmem:[%s1044_s1 + $0xa8] sm:$0xff]  ;;  %s703_s9 = sshll.u32 %s1053_s22, 1 }
  0x19   : > { %306 = vrot.lane.b32.xlu0 %v303_v24, %s772_s14  ;;  %534 = vmatpush.msrb.mxu1 %v741_v41  ;;  %v737_v53 = vld [vmem:[%s1044_s1 + $0x178] sm:$0xff]  ;;  %v743_v54 = vld [vmem:[%s1044_s1 + $0x1a8] sm:$0xff]  ;;  %v706_v55 = vld [vmem:[%s1044_s1 + $0xa0] sm:$0xff]  ;;  %s262_s18 = scalar_lea.vmem %s1049_s6, %s703_s9 }
  0x1a   : > { %451 = vmatpush.msra.mxu2 %v336_v26  ;;  %399 = vmatpush.msra.mxu0 %v713_v33  ;;  %v736_v56 = vld [vmem:[%s1044_s1 + $0x170] sm:$0xff]  ;;  %v705_v57 = vld [vmem:[%s1044_s1 + $0x98] sm:$0xff]  ;;  %v735_v58 = vld [vmem:[%s1044_s1 + $0x168] sm:$0xff] }
  0x1b   : > { %481 = vmatpush.msra.mxu3 %v345_v43  ;;  %535 = vmatpush.msrb.mxu1 %v740_v45  ;;  %v704_v59 = vld [vmem:[%s1044_s1 + $0x90] sm:$0xff]  ;;  %v734_v60 = vld [vmem:[%s1044_s1 + $0x160] sm:$0xff]  ;;  %v733_v61 = vld [vmem:[%s1044_s1 + $0x158] sm:$0xff] }
  0x1c   : > { %452 = vmatpush.msra.mxu2 %v335_v27  ;;  %400 = vmatpush.msra.mxu0 %v712_v36  ;;  %v742_v62 = vld [vmem:[%s1044_s1 + $0x1a0] sm:$0xff]  ;;  %v732_v63 = vld [vmem:[%s1044_s1 + $0x150] sm:$0xff]  ;;  %v731_v0 = vld [vmem:[%s1044_s1 + $0x148] sm:$0xff] }
  0x1d   : > { %482 = vmatpush.msra.mxu3 %v344_v47  ;;  %536 = vmatpush.msrb.mxu1 %v739_v49  ;;  %v730_v1 = vld [vmem:[%s1044_s1 + $0x140] sm:$0xff]  ;;  %v729_v2 = vld [vmem:[%s1044_s1 + $0x138] sm:$0xff]  ;;  %v728_v3 = vld [vmem:[%s1044_s1 + $0x130] sm:$0xff] }
  0x1e   : > { %453 = vmatpush.msra.mxu2 %v334_v28  ;;  %401 = vmatpush.msra.mxu0 %v711_v39  ;;  %v727_v4 = vld [vmem:[%s1044_s1 + $0x128] sm:$0xff]  ;;  %v726_v7 = vld [vmem:[%s1044_s1 + $0x120] sm:$0xff] }
  0x1f   : > { %537 = vmatpush.msrb.mxu1 %v738_v51  ;;  %571 = vmatpush.msrb.mxu3 %v743_v54 }
  0x20   : > { %454 = vmatpush.msra.mxu2 %v333_v29  ;;  %402 = vmatpush.msra.mxu0 %v710_v44 }
  0x21   : > { %308 = vrot.lane.b32.xlu0 %v305_v30, %s772_s14  ;;  %538 = vmatpush.msrb.mxu1 %v737_v53 }
  0x22   : > { %455 = vmatpush.msra.mxu2 %v332_v31  ;;  %403 = vmatpush.msra.mxu0 %v709_v48 }
  0x23   : > { %539 = vmatpush.msrb.mxu1 %v736_v56  ;;  %572 = vmatpush.msrb.mxu3 %v742_v62 }
  0x24   : > { %456 = vmatpush.msra.mxu2 %v331_v35  ;;  %404 = vmatpush.msra.mxu0 %v708_v50 }
  0x25   : > { %540 = vmatpush.msrb.mxu1 %v735_v58 }
  0x26   : > { %457 = vmatpush.msra.mxu2 %v330_v38  ;;  %405 = vmatpush.msra.mxu0 %v707_v52 }
  0x27   : > { %541 = vmatpush.msrb.mxu1 %v734_v60 }
  0x28   : > { %458 = vmatpush.msra.mxu2 %v329_v42  ;;  %406 = vmatpush.msra.mxu0 %v706_v55  ;;  %v762_v55 = vld [vmem:[%s1045_s2] ss:$0 sm:$0xff] }
  0x29   : > { %542 = vmatpush.msrb.mxu1 %v733_v61 }
  0x2a   : > { %459 = vmatpush.msra.mxu2 %v328_v46  ;;  %407 = vmatpush.msra.mxu0 %v705_v57 }
  0x2b   : > { %543 = vmatpush.msrb.mxu1 %v732_v63 }
  0x2c   : > { %408 = vmatpush.msra.mxu0 %v704_v59 }
  0x2d   : > { %544 = vmatpush.msrb.mxu1 %v731_v0 }
  0x2f   : > { %545 = vmatpush.msrb.mxu1 %v730_v1 }
  0x31   : > { %546 = vmatpush.msrb.mxu1 %v729_v2 }
  0x33   : > { %547 = vmatpush.msrb.mxu1 %v728_v3 }
  0x35   : > { %548 = vmatpush.msrb.mxu1 %v727_v4 }
  0x37   : > { %549 = vmatpush.msrb.mxu1 %v726_v7 }
  0x89   : > { %v311_v6 = vpop.permute.xlu1 %310 }
  0x8a   : > { %322 = vst.msk [vmem:[#allocation2 + $0x20] sm:$0x1] %vm321_vm9, %v311_v6 }
  0x8b   : > { %v307_v5 = vpop.permute.xlu0 %306  ;;  %323 = vst.msk [vmem:[#allocation2 + $0x28] sm:$0x1] %vm292_vm3, %v311_v6 }
  0x8c   : > { %316 = vst.msk [vmem:[#allocation2] sm:$0xfe] %vm315_vm8, %v307_v5 }
  0x8d   : > { %317 = vst.msk [vmem:[#allocation2 + $0x8] sm:$0xfe] %vm288_vm0, %v307_v5 }
  0x91   : > { %v348_v22 = vld [vmem:[#allocation2 + $0x20] sm:$0x1] }
  0x92   : > { %v349_v24 = vld [vmem:[#allocation2 + $0x28] sm:$0x1]  ;;  %v382_v26 = vrot.slane %v348_v22, 1  ;;  %v492_v38 = vld [vmem:[#allocation2 + $0x20] sm:$0x3] }
  0x93   : > { %v309_v8 = vpop.permute.xlu0 %308  ;;  %v324_v9 = vld [vmem:[#allocation2] sm:$0xff]  ;;  %v384_v27 = vrot.slane %v349_v24, 1  ;;  %v493_v29 = vld [vmem:[#allocation2 + $0x28] sm:$0x3]  ;;  %v524_v39 = vrot.slane %v492_v38, 2 }
  0x94   : > { %319 = vst.msk [vmem:[#allocation2 + $0x10] sm:$0xff] %vm318_vm10, %v309_v8  ;;  %460 = vmatmul.f32.vlgmr.msra.gmra.mxu2 %v324_v9  ;;  %v325_v10 = vld [vmem:[#allocation2 + $0x8] sm:$0xff]  ;;  %v346_v11 = vld [vmem:[#allocation2] sm:$0xfe]  ;;  %v526_v32 = vrot.slane %v493_v29, 2 }
  0x95   : > { %320 = vst.msk [vmem:[#allocation2 + $0x18] sm:$0xff] %vm290_vm6, %v309_v8  ;;  %724 = vmatmul.msk.f32.vlgmr.msra.gmra.mxu3 %vm388_vm11, %v325_v10  ;;  %v347_v12 = vld [vmem:[#allocation2 + $0x8] sm:$0xfe]  ;;  %v376_v16 = vrot.slane %v346_v11, 1  ;;  %v490_v33 = vld [vmem:[#allocation2] sm:$0xfc] }
  0x96   : > { %v379_v18 = vrot.slane %v347_v12, 1  ;;  %v491_v21 = vld [vmem:[#allocation2 + $0x8] sm:$0xfc]  ;;  %v518_v36 = vrot.slane %v490_v33, 2 }
  0x97   : > { %v521_v25 = vrot.slane %v491_v21, 2 }
  0x9b   : > { %v326_v13 = vld [vmem:[#allocation2 + $0x10] sm:$0xff] }
  0x9c   : > { %v377_v14 = vrot.slane %v326_v13, 1  ;;  %463 = vmatmul.f32.gmra.mxu2 %v326_v13  ;;  %v327_v15 = vld [vmem:[#allocation2 + $0x18] sm:$0xff]  ;;  %v519_v34 = vrot.slane %v326_v13, 2 }
  0x9d   : > { %v380_v17 = vrot.slane %v327_v15, 1  ;;  %725 = vmatmul.msk.f32.gmra.mxu3 %vm388_vm11, %v327_v15  ;;  %v522_v23 = vrot.slane %v327_v15, 2 }
  0x9e   : > { %v378_v19 = vsel %vm375_vm12, %v376_v16, %v377_v14  ;;  %v383_v30 = vsel %vm375_vm12, %v377_v14, %v382_v26  ;;  %v520_v37 = vsel %vm517_vm13, %v518_v36, %v519_v34  ;;  %v525_v40 = vsel %vm517_vm13, %v519_v34, %v524_v39 }
  0x9f   : > { %409 = vmatmul.f32.vlgmr.msra.gmra.mxu0 %v378_v19  ;;  %v381_v20 = vsel %vm375_vm12, %v379_v18, %v380_v17  ;;  %v523_v28 = vsel %vm517_vm13, %v521_v25, %v522_v23  ;;  %v385_v31 = vsel %vm375_vm12, %v380_v17, %v384_v27  ;;  %v527_v35 = vsel %vm517_vm13, %v522_v23, %v526_v32 }
  0xa0   : > { %722 = vmatmul.msk.f32.vlgmr.msra.gmra.mxu1 %vm388_vm11, %v381_v20 }
  0xa5   : > { %744 = vmatmul.msk.f32.vlgmr.msrb.gmra.mxu3 %vm388_vm11, %v523_v28 }
  0xa7   : > { %412 = vmatmul.f32.gmra.mxu0 %v383_v30 }
  0xa8   : > { %723 = vmatmul.msk.f32.gmra.mxu1 %vm388_vm11, %v385_v31 }
  0xad   : > { %745 = vmatmul.msk.f32.gmra.mxu3 %vm388_vm11, %v527_v35 }
  0xb0   : > { %550 = vmatmul.f32.vlgmr.msrb.gmra.mxu1 %v520_v37 }
  0xb8   : > { %553 = vmatmul.f32.gmra.mxu1 %v525_v40 }
 0x117   : > { %v461_v47 = vpop.f32.mrf.mxu2 }
 0x118   : > { %v484_v41 = vpop.f32.mrf.mxu3 }
 0x11c   : > { %v410_v43 = vpop.f32.mrf.mxu0 }
 0x11d   : > { %v433_v42 = vpop.f32.mrf.mxu1 }
 0x11e   : > { %v434_v46 = vadd.f32 %v433_v42, %v410_v43 }
 0x11f   : > { %v464_v57 = vpop.f32.mrf.mxu2 }
 0x120   : > { %v487_v44 = vpop.f32.mrf.mxu3  ;;  %v462_v48 = vadd.f32 %v461_v47, %v434_v46 }
 0x122   : > { %v485_v53 = vadd.f32 %v484_v41, %v462_v48 }
 0x124   : > { %v413_v49 = vpop.f32.mrf.mxu0 }
 0x125   : > { %v436_v45 = vpop.f32.mrf.mxu1 }
 0x126   : > { %v437_v52 = vadd.f32 %v436_v45, %v413_v49 }
 0x128   : > { %v574_v50 = vpop.f32.mrf.mxu3  ;;  %v465_v58 = vadd.f32 %v464_v57, %v437_v52 }
 0x12a   : > { %v488_v62 = vadd.f32 %v487_v44, %v465_v58 }
 0x12d   : > { %v551_v51 = vpop.f32.mrf.mxu1 }
 0x12e   : > { %v575_v54 = vadd.f32 %v574_v50, %v551_v51 }
 0x130   : > { %v580_v56 = vadd.f32 %v575_v54, %v485_v53  ;;  %v577_v60 = vpop.f32.mrf.mxu3 }
 0x132   : > { %v586_v59 = vadd.f32 %v762_v55, %v580_v56 }
 0x134   : > { %588 = vst [vmem:[%s258_s15] sm:$0xff] %v586_v59  ;;  %v598_v2 = vmul.f32 %v586_v59, %v586_v59 }
 0x135   : > { %v554_v61 = vpop.f32.mrf.mxu1 }
 0x136   : > { %v578_v63 = vadd.f32 %v577_v60, %v554_v61 }
 0x138   : > { %v581_v0 = vadd.f32 %v578_v63, %v488_v62 }
 0x13a   : > { %v587_v1 = vadd.f32 %v762_v55, %v581_v0 }
 0x13c   : > { %589 = vst [vmem:[%s258_s15 + $0x8] sm:$0xff] %v587_v1  ;;  %v590_v3 = vadd.f32 %v587_v1, %v586_v59  ;;  %v599_v4 = vmul.f32 %v587_v1, %v587_v1 }
 0x13e   : > { %v591_v5 = vrot.slane %v590_v3, 4  ;;  %v600_v6 = vadd.f32 %v599_v4, %v598_v2 }
 0x140   : > { %v592_v7 = vadd.f32 %v591_v5, %v590_v3  ;;  %v601_v8 = vrot.slane %v600_v6, 4 }
 0x142   : > { %v593_v9 = vrot.slane %v592_v7, 2  ;;  %v602_v10 = vadd.f32 %v601_v8, %v600_v6 }
 0x144   : > { %v594_v11 = vadd.f32 %v593_v9, %v592_v7  ;;  %v603_v12 = vrot.slane %v602_v10, 2 }
 0x146   : > { %v595_v13 = vrot.slane %v594_v11, 1  ;;  %v604_v14 = vadd.f32 %v603_v12, %v602_v10 }
 0x148   : > { %v596_v15 = vadd.f32 %v595_v13, %v594_v11  ;;  %v605_v16 = vrot.slane %v604_v14, 1 }
 0x14a   : > { %597 = vst [vmem:[%s262_s18] sm:$0x1] %v596_v15  ;;  %v606_v17 = vadd.f32 %v605_v16, %v604_v14 }
 0x14c   : > { %607 = vst [vmem:[%s262_s18 + $0x1] sm:$0x1] %v606_v17 }
 0x14d PF: > { %s17_s21 = sadd.s32 1, %s769_s21  }
 0x14e   : > { %p14_p4 = scmp.ge.s32.totalorder %s17_s21, 4  }
 0x150   :  { %16 = sbr.rel (!%p14_p4) target bundleno = 1 (0x1), region = 85 }

// kernel: double_conv_forward.5
= control target key start
LH: loop header
LB: loop body
LE: loop exit
PB: predicated region body
PF: predicated region fallthrough
CT: control target
= control target key end

     0   :  { %s295_s12 = smov 0   ;;  %s312_s0 = inlined_call_operand.vmem [shape: f32[2,16,128], index: 0, kind: input, shape index: {}]   ;;  %s313_s1 = inlined_call_operand.vmem [shape: f32[1,128], index: 1, kind: input, shape index: {}]   ;;  %s314_s2 = inlined_call_operand.vmem [shape: f32[1,128], index: 2, kind: input, shape index: {}]   ;;  %s315_s3 = inlined_call_operand.vmem [shape: f32[2,16,128], index: 3, kind: output, shape index: {}]  }
   0x1 LB: > { %s244_s13 = sadd.s32 4294967295, %s273_s12   ;;  %p248_p0 = scmp.ge.s32.totalorder %s273_s12, 1  ;;  %s273_s12 = sphi %s295_s12, %s13_s12  }
   0x2   : > { %p137_p1 = scmp.lt.s32.totalorder %s273_s12, 3 }
   0x4   : > { %p138_p2 = pnand %p248_p0, %p137_p1 }
   0x5   : > { %p161_p3 = scmp.lt.s32.totalorder (!%p138_p2), %s244_s13, 1 }
   0x6   : > { %141 = sbr.rel (%p138_p2) target bundleno = 23 (0x17), region = 32 }
   0xb   : > { %s317_s13 = smov (!%p161_p3, %s244_s13), 1  ;;  %v265_v0 = vld [vmem:[%s313_s1] ss:$0 sm:$0xff] }
   0xc   : > { %s255_s16 = sshll.u32 %s317_s13, 4  ;;  %v266_v1 = vld [vmem:[%s314_s2] ss:$0 sm:$0xff] }
   0xd   : > { %s165_s19 = scalar_lea.vmem %s312_s0, %s255_s16  ;;  %s170_s24 = scalar_lea.vmem %s315_s3, %s255_s16 }
   0xe   : > { %v171_v2 = vld [vmem:[%s165_s19] sm:$0xff]  ;;  %v172_v3 = vld [vmem:[%s165_s19 + $0x8] sm:$0xff] }
   0xf   : > { %v177_v4 = vmul.f32 %v265_v0, %v171_v2  ;;  %v178_v5 = vmul.f32 %v265_v0, %v172_v3 }
  0x11   : > { %v183_v6 = vadd.f32 %v266_v1, %v177_v4  ;;  %v184_v7 = vadd.f32 %v266_v1, %v178_v5 }
  0x13   : > { %v185_v8 = vmax.f32 %v183_v6, 0.0  ;;  %v186_v9 = vmax.f32 %v184_v7, 0.0 }
  0x15   : > { %187 = vst [vmem:[%s170_s24] sm:$0xff] %v185_v8 }
  0x16   : > { %188 = vst [vmem:[%s170_s24 + $0x8] sm:$0xff] %v186_v9 }
  0x17 PF: > { %s13_s12 = sadd.s32 1, %s273_s12  }
  0x18   : > { %p10_p4 = scmp.ge.s32.totalorder %s13_s12, 4  }
  0x1a   :  { %12 = sbr.rel (!%p10_p4) target bundleno = 1 (0x1), region = 62 }

</bundles_post_ra>
